<compile_context>
chip_gen: v7x
topology: tpu7x:2x2x1
jax: 0.10.0
libtpu: 0.0.40
codegen_flags: <defaults>
</compile_context>

<pallas_src>
import jax
import jax.numpy as jnp
from jax.experimental import pallas as pl
from jax.experimental.pallas import tpu as pltpu


def fair_lora_fused_kernel(w_ref, b_ref, x_ref, o_ref):
    """One M-tile of: y = x @ W_eff^T + bias.

    x_ref: (tm, in), w_ref: (out, in), b_ref: (1, out) f32, o_ref: (tm, out) f32.
    """
    acc = jax.lax.dot_general(
        x_ref[...], w_ref[...],
        dimension_numbers=(((1,), (1,)), ((), ())),   # contract on in_features
        preferred_element_type=jnp.float32,
    )
    o_ref[...] = (acc + b_ref[...]).astype(o_ref.dtype)


def _round_up(v, m):
    return ((v + m - 1) // m) * m


def _choose_tile(M, tm_request):
    """Pick (tm_used, n_tiles). Big tiles, but >=2 tiles when M allows (v7x)."""
    if M <= 128:
        return max(8, _round_up(M, 8)), 1
    tm_req = max(128, (int(tm_request) // 128) * 128)
    m128 = _round_up(M, 128)
    n_tiles = max(2, pl.cdiv(m128, tm_req))          # >=2: shard across v7x TCs
    tm_used = _round_up(pl.cdiv(m128, n_tiles), 128)
    n_tiles = pl.cdiv(M, tm_used)
    return tm_used, n_tiles


def fair_lora_linear(x2d, w, bias, lora_a, scale_mat, lora_b, *, alpha, r,
                     tm=4096, compute_dtype=None, min_m_pallas=4096):
    """x2d: (M, in). Returns (M, out) f32.

    Folds the FairLoRA adapter into an effective weight (tiny XLA work), then
    runs a single GEMM+bias kernel tiled over M in natural layout.
    """
    M, in_f = x2d.shape
    out_f = w.shape[0]
    scaling = float(alpha) / float(r)

    # --- adapter fold in f32 (correct transpose: dW = B @ S^T @ A) ---
    w_eff = (w.astype(jnp.float32)
             + scaling * (lora_b.astype(jnp.float32)
                          @ scale_mat.T.astype(jnp.float32)
                          @ lora_a.astype(jnp.float32)))

    # Compute dtype follows x unless overridden (avoid an extra cast pass of x).
    cdt = jnp.dtype(compute_dtype) if compute_dtype is not None else x2d.dtype
    w_eff = w_eff.astype(cdt)
    x_c = x2d if x2d.dtype == cdt else x2d.astype(cdt)
    bias_row = jnp.reshape(bias, (1, out_f)).astype(jnp.float32)

    if M < min_m_pallas:
        # Small-M gate: fused XLA GEMM + bias beats any pallas_call launch here.
        y = jax.lax.dot_general(x_c, w_eff, (((1,), (1,)), ((), ())),
                                preferred_element_type=jnp.float32)
        return (y + bias_row).astype(jnp.float32)

    tm_used, n_tiles = _choose_tile(M, tm)

    # VMEM budget: double-buffered x / out tiles + resident W_eff / bias.
    itemsize = jnp.dtype(cdt).itemsize
    vmem_needed = (2 * tm_used * in_f * itemsize       # x tiles
                   + 2 * tm_used * out_f * 4           # output tiles (f32)
                   + 2 * out_f * in_f * itemsize       # W_eff
                   + 2 * out_f * 4)                    # bias
    vmem_limit = int(min(64 << 20, max(16 << 20, 2 * vmem_needed + (4 << 20))))

    y = pl.pallas_call(
        fair_lora_fused_kernel,
        out_shape=jax.ShapeDtypeStruct((M, out_f), jnp.float32),
        grid_spec=pltpu.PrefetchScalarGridSpec(
            num_scalar_prefetch=0,
            grid=(n_tiles,),
            in_specs=[
                pl.BlockSpec((out_f, in_f), lambda i: (0, 0)),   # W_eff (resident)
                pl.BlockSpec((1, out_f), lambda i: (0, 0)),      # bias (resident)
                pl.BlockSpec((tm_used, in_f), lambda i: (i, 0)),  # x M-tile
            ],
            out_specs=pl.BlockSpec((tm_used, out_f), lambda i: (i, 0)),
        ),
        compiler_params=pltpu.CompilerParams(
            dimension_semantics=("parallel",),
            vmem_limit_bytes=vmem_limit),
    )(w_eff, bias_row, x_c)
    return y


def fair_lora_model_forward(x, params, *, alpha, r, demographic="default",
                            tm=4096, compute_dtype=None, min_m_pallas=4096):
    """x: (B, S, H). Base linear + FairLoRA adapter for the chosen demographic."""
    B, S, H = x.shape
    x2d = x.reshape(B * S, H)
    if demographic not in params["scaling_matrices"]:
        demographic = "default"
    s_mat = params["scaling_matrices"][demographic]
    y2d = fair_lora_linear(
        x2d,
        params["W"], params["bias"],
        params["lora_A"], s_mat, params["lora_B"],
        alpha=alpha, r=r, tm=tm,
        compute_dtype=compute_dtype, min_m_pallas=min_m_pallas,
    )
    out_f = params["W"].shape[0]
    return y2d.reshape(B, S, out_f)


def reference_forward(x, params, *, alpha, r, demographic="default"):
    B, S, H = x.shape
    x2d = x.reshape(B * S, H).astype(jnp.float32)
    base = x2d @ params["W"].astype(jnp.float32).T + jnp.reshape(
        params["bias"], (1, -1)).astype(jnp.float32)
    t = x2d @ params["lora_A"].astype(jnp.float32).T
    t = t @ params["scaling_matrices"][demographic].astype(jnp.float32)
    lora = t @ params["lora_B"].astype(jnp.float32).T
    y = base + lora * (alpha / r)
    return y.reshape(B, S, -1)


if __name__ == "__main__":
    # Config consistent with FairLoRAConfig defaults: r=8, alpha=16.0
    B, S, H = 2, 8, 32          # batch, seq, hidden (in_features)
    OUT = 32                    # out_features of the wrapped nn.Linear
    R = 8
    ALPHA = 16.0
    GROUPS = ["default", "group_a"]

    key = jax.random.PRNGKey(0)
    kx, kw, kb, ka, kbm, ks = jax.random.split(key, 6)

    x = jax.random.normal(kx, (B, S, H), dtype=jnp.float32)

    # Deterministic parameter init (shapes from FairLoRALayer.__init__ /
    # nn.Linear). lora_B / scaling matrices get nonzero deterministic values so
    # the LoRA path is numerically exercised (PyTorch init zeros lora_B, which
    # would make the adapter path identically zero).
    params = {
        "W": jax.random.normal(kw, (OUT, H), dtype=jnp.float32) * 0.1,
        "bias": jax.random.normal(kb, (1, OUT), dtype=jnp.float32) * 0.1,
        "lora_A": jax.random.normal(ka, (R, H), dtype=jnp.float32) * 0.1,
        "lora_B": jax.random.normal(kbm, (OUT, R), dtype=jnp.float32) * 0.1,
        "scaling_matrices": {
            g: jnp.eye(R, dtype=jnp.float32)
               + 0.01 * jax.random.normal(jax.random.fold_in(ks, i), (R, R),
                                          dtype=jnp.float32)
            for i, g in enumerate(GROUPS)
        },
    }

    # --- small shape, f32 path (strict tolerance); gate disabled so the Pallas
    # kernel itself runs even at M=16 ---
    y = fair_lora_model_forward(x, params, alpha=ALPHA, r=R,
                                demographic="group_a",
                                compute_dtype=jnp.float32, min_m_pallas=0)
    y = jax.block_until_ready(y)
    y_ref = reference_forward(x, params, alpha=ALPHA, r=R,
                              demographic="group_a")
    assert y.shape == (B, S, OUT)
    assert jnp.allclose(y, y_ref, atol=1e-4, rtol=1e-4), "mismatch (small f32)"

    # --- larger shape (M = 2048 -> 2 grid steps), bf16 activations: the
    # production path (bf16 MXU operands, f32 accumulation) ---
    B2, S2 = 4, 512
    x_big = jax.random.normal(jax.random.fold_in(key, 99), (B2, S2, H),
                              dtype=jnp.float32).astype(jnp.bfloat16)
    y_big = fair_lora_model_forward(x_big, params, alpha=ALPHA, r=R,
                                    demographic="default", min_m_pallas=0)
    y_big = jax.block_until_ready(y_big)
    y_big_ref = reference_forward(x_big.astype(jnp.float32), params,
                                  alpha=ALPHA, r=R, demographic="default")
    assert y_big.shape == (B2, S2, OUT)
    assert jnp.allclose(y_big, y_big_ref, atol=5e-2, rtol=5e-2), "mismatch (big bf16)"

    print("KERNEL_OK")
</pallas_src>

<mosaic_0001>
module attributes {stable_mosaic.version = 11 : i64} {
  func.func @fair_lora_fused_kernel(%arg0: i32, %arg1: memref<32x32xf32, #tpu.memory_space<vmem>>, %arg2: memref<1x32xf32, #tpu.memory_space<vmem>>, %arg3: memref<16x32xf32, #tpu.memory_space<vmem>>, %arg4: memref<16x32xf32, #tpu.memory_space<vmem>>) attributes {dimension_semantics = [#tpu.dimension_semantics<parallel>], iteration_bounds = array<i64: 1>, scalar_prefetch = 0 : i64, scratch_operands = 0 : i64, tpu.core_type = #tpu.core_type<tc>, window_params = [{pipeline_mode = #tpu.pipeline_mode<synchronous>, transform_indices = @transform_0, window_bounds = array<i64: 32, 32>}, {pipeline_mode = #tpu.pipeline_mode<synchronous>, transform_indices = @transform_1, window_bounds = array<i64: 1, 32>}, {transform_indices = @transform_2, window_bounds = array<i64: 16, 32>}, {transform_indices = @transform_3, window_bounds = array<i64: 16, 32>}]} {
    %c0 = arith.constant 0 : index
    %c0_0 = arith.constant 0 : index
    %0 = vector.load %arg3[%c0, %c0_0] : memref<16x32xf32, #tpu.memory_space<vmem>>, vector<16x32xf32>
    %c0_1 = arith.constant 0 : index
    %c0_2 = arith.constant 0 : index
    %1 = vector.load %arg1[%c0_1, %c0_2] : memref<32x32xf32, #tpu.memory_space<vmem>>, vector<32x32xf32>
    %cst = arith.constant dense<0.000000e+00> : vector<16x32xf32>
    %2 = tpu.matmul %0, %1, %cst {dimension_numbers = #tpu.dot_dimension_numbers<[1], [1], [0], [0], [0, 0, 1, 0], [], []>} : vector<16x32xf32>, vector<32x32xf32>, vector<16x32xf32> -> vector<16x32xf32>
    %c0_3 = arith.constant 0 : index
    %c0_4 = arith.constant 0 : index
    %3 = vector.load %arg2[%c0_3, %c0_4] : memref<1x32xf32, #tpu.memory_space<vmem>>, vector<1x32xf32>
    %4 = vector.broadcast %3 : vector<1x32xf32> to vector<16x32xf32>
    %5 = arith.addf %2, %4 : vector<16x32xf32>
    %c0_5 = arith.constant 0 : index
    %c0_6 = arith.constant 0 : index
    %6 = vector.load %arg4[%c0_5, %c0_6] : memref<16x32xf32, #tpu.memory_space<vmem>>, vector<16x32xf32>
    tpu.vector_store %arg4[%c0_5, %c0_6], %5 {strides = array<i32>} : memref<16x32xf32, #tpu.memory_space<vmem>>, vector<16x32xf32>,
    return
  }
  func.func @transform_0(%arg0: i32) -> (i32, i32) {
    %c0_i32 = arith.constant 0 : i32
    %c0_i32_0 = arith.constant 0 : i32
    %c0_i32_1 = arith.constant 0 : i32
    return %c0_i32, %c0_i32_0 : i32, i32
  }
  func.func @transform_1(%arg0: i32) -> (i32, i32) {
    %c0_i32 = arith.constant 0 : i32
    %c0_i32_0 = arith.constant 0 : i32
    %c0_i32_1 = arith.constant 0 : i32
    return %c0_i32, %c0_i32_0 : i32, i32
  }
  func.func @transform_2(%arg0: i32) -> (i32, i32) {
    %c0_i32 = arith.constant 0 : i32
    %c0_i32_0 = arith.constant 0 : i32
    return %arg0, %c0_i32 : i32, i32
  }
  func.func @transform_3(%arg0: i32) -> (i32, i32) {
    %c0_i32 = arith.constant 0 : i32
    %c0_i32_0 = arith.constant 0 : i32
    return %arg0, %c0_i32 : i32, i32
  }
}

</mosaic_0001>

<bundles_post_ra>
// kernel: tpu_custom_call.1
= control target key start
LH: loop header
LB: loop body
LE: loop exit
PB: predicated region body
PF: predicated region fallthrough
CT: control target
= control target key end

     0   :  { %8 = vsyncpa [#allocation3], 0  ;;  %s362_s0 = inlined_call_operand.hbm [shape: f32[32,32], index: 0, kind: input, shape index: {}]   ;;  %s363_s1 = inlined_call_operand.vmem [shape: f32[1,32], index: 1, kind: input, shape index: {}]   ;;  %s364_s2 = inlined_call_operand.hbm [shape: f32[16,32], index: 2, kind: input, shape index: {}]   ;;  %s365_s3 = inlined_call_operand.hbm [shape: f32[16,32], index: 3, kind: output, shape index: {}]  }
   0x1   :  { %9 = vsyncpa [#allocation6], 0 }
   0x2   :  { %10 = vsyncpa [#allocation4], 0  ;;  %s283_s12 = smov [#allocation2]   ;;  %s211_s16 = scalar_lea.hbm %s362_s0, 512 }
   0x3   :  { %s16_s13 = sshll.u32 %s283_s12, 4  ;;  %p212_p0 = scmp.ne.s32.totalorder %s362_s0, %s211_s16  ;;  %s17_s13 = int_to_ptr.vmem [resolvable:$true] %s16_s13 }
   0x4   :  { %p215_p1 = scmp.lt.u32.totalorder %s211_s16, %s362_s0 }
   0x6   :  { %p217_p2 = pnand %p215_p1, %p212_p0 }
   0x8   :  { %220 = shalt.err (!%p217_p2)
}
   0x9   :  { %s221_s21 = scalar_lea.vmem %s17_s13, 512  ;;  %p226_p4 = scmp.lt.s32.totalorder %s17_s13, %s17_s13 }
   0xa   :  { %p222_p3 = scmp.ne.s32.totalorder %s17_s13, %s221_s21  ;;  %p227_p5 = scmp.lt.s32.totalorder %s221_s21, %s221_s21 }
   0xc   :  { %p228_p6 = por %p227_p5, %p226_p4 }
   0xe   :  { %p229_p7 = pnand %p228_p6, %p222_p3 }
  0x10   :  { %232 = shalt.err (!%p229_p7)
}
  0x11   :  { %s284_s22 = smov 128   ;;  %s285_s23 = smov 8  }
  0x12   :  { %22 = dma.hbm_to_vmem [thread:$0]  %s362_s0, 512, %s17_s13, [#allocation3], %s284_s22, %s284_s22, %s285_s23  }
  0x13   :  { %s286_s26 = smov [#allocation5]   ;;  %s233_s30 = scalar_lea.hbm %s364_s2, 256 }
  0x14   :  { %s30_s27 = sshll.u32 %s286_s26, 4  ;;  %p234_p8 = scmp.ne.s32.totalorder %s364_s2, %s233_s30  ;;  %s31_s27 = int_to_ptr.vmem [resolvable:$true] %s30_s27 }
  0x15   :  { %p237_p9 = scmp.lt.u32.totalorder %s233_s30, %s364_s2 }
  0x17   :  { %p239_p10 = pnand %p237_p9, %p234_p8 }
  0x19   :  { %242 = shalt.err (!%p239_p10)
}
  0x1a   :  { %s243_s8 = scalar_lea.vmem %s31_s27, 256  ;;  %p248_p12 = scmp.lt.s32.totalorder %s31_s27, %s31_s27 }
  0x1b   :  { %p244_p11 = scmp.ne.s32.totalorder %s31_s27, %s243_s8  ;;  %p249_p13 = scmp.lt.s32.totalorder %s243_s8, %s243_s8 }
  0x1d   :  { %p250_p0 = por %p249_p13, %p248_p12 }
  0x1f   :  { %p251_p1 = pnand %p250_p0, %p244_p11 }
  0x21   :  { %254 = shalt.err (!%p251_p1)
}
  0x22   :  { %36 = dma.hbm_to_vmem [thread:$0]  %s364_s2, 256, %s31_s27, [#allocation6], %s284_s22, %s284_s22, %s285_s23  }
  0x23   :  { %277 = dma.done.wait [#allocation3], 512  }
  0x24   :  { %278 = vsyncadd [#allocation3], 4294966784 }
  0x25   :  { %279 = dma.done.wait [#allocation6], 256  }
  0x26   :  { %280 = vsyncadd [#allocation6], 4294967040  ;;  %vm56_vm0 = vcmask 261120   ;;  %v45_v0 = vld [vmem:[#allocation2] sm:$0xff]  ;;  %v46_v1 = vld [vmem:[#allocation2 + $0x8] sm:$0xff]  ;;  %s287_s11 = smov [#allocation7]  }
  0x27   :  { %vm195_vm1 = vmpackc.low %vm56_vm0, %vm56_vm0  ;;  %v47_v2 = vld [vmem:[#allocation2 + $0x10] sm:$0xff]  ;;  %v194_v3 = vpack.c.bf16 %v46_v1, %v45_v0  ;;  %v48_v4 = vld [vmem:[#allocation2 + $0x18] sm:$0xff]  ;;  %s157_s12 = sshll.u32 %s287_s11, 4  ;;  %s158_s12 = int_to_ptr.vmem [resolvable:$true] %s157_s12 }
  0x28   :  { %v43_v5 = vld [vmem:[#allocation5] sm:$0xff]  ;;  %v200_v6 = vpack.c.bf16 %v48_v4, %v47_v2  ;;  %v44_v7 = vld [vmem:[#allocation5 + $0x8] sm:$0xff]  ;;  %s255_s13 = scalar_lea.vmem %s158_s12, 256  ;;  %p260_p3 = scmp.lt.s32.totalorder %s158_s12, %s158_s12 }
  0x29   :  { %191 = vmatprep.mubr.msk.f32.mxu0 %vm56_vm0, %v43_v5  ;;  %196 = vmatprep.subr.msk.bf16.mxu0 %vm195_vm1, %v194_v3  ;;  %v170_v8 = vld [vmem:[%s363_s1] ss:$0 sm:$0xff]  ;;  %p256_p2 = scmp.ne.s32.totalorder %s158_s12, %s255_s13  ;;  %p261_p4 = scmp.lt.s32.totalorder %s255_s13, %s255_s13 }
  0x2a   :  { %199 = vmatpush3.bf16.xpose.msk.msra.mxu0 %vm195_vm1, %v194_v3 }
  0x2b   :  { %202 = vmatprep.subr.msk.bf16.mxu0 %vm195_vm1, %v200_v6  ;;  %p262_p5 = por %p261_p4, %p260_p3 }
  0x2d   :  { %p263_p6 = pnand %p262_p5, %p256_p2 }
  0x32   :  { %205 = vmatpush3.bf16.xpose.msk.msra.mxu0 %vm195_vm1, %v200_v6 }
  0x39   :  { %192 = vmatmul.mubr.msk.f32.vlgmr.msra.gmra.mrb[0].mxu0 %vm56_vm0, %v44_v7 }
 0x10c   :  { %v193_v9 = vpop.f32.mrb[0].mxu0 }
 0x10d   :  { %v147_v10 = vadd.f32 %v193_v9, %v170_v8  ;;  %v141_v11 = vpop.f32.mrb[1].mxu0 }
 0x10e   :  { %v142_v12 = vadd.f32 %v170_v8, %v141_v11 }
 0x10f   :  { %151 = vst.msk [vmem:[#allocation7 + $0x8] sm:$0xff] %vm56_vm0, %v147_v10 }
 0x110   :  { %150 = vst.msk [vmem:[#allocation7] sm:$0xff] %vm56_vm0, %v142_v12 }
 0x111   :  { %266 = shalt.err (!%p263_p6)
}
 0x112   :  { %s267_s15 = scalar_lea.hbm %s365_s3, 256 }
 0x113   :  { %p268_p7 = scmp.ne.s32.totalorder %s365_s3, %s267_s15  ;;  %p271_p8 = scmp.lt.u32.totalorder %s267_s15, %s365_s3 }
 0x115   :  { %p273_p9 = pnand %p271_p8, %p268_p7 }
 0x117   :  { %276 = shalt.err (!%p273_p9)
}
 0x118   :  { %163 = dma.vmem_to_hbm [thread:$0]  %s158_s12, 256, %s365_s3, [#allocation4], %s284_s22, %s284_s22, %s285_s23  }
 0x119   :  { %281 = dma.done.wait [#allocation4], 256  }
 0x11a   :  { %282 = vsyncadd [#allocation4], 4294967040 }
 0x11b   :  { %167 = vsyncpa [#allocation3], 1 }
 0x11c   :  { %168 = vsyncpa [#allocation6], 1 }
 0x11d   :  { %169 = vsyncpa [#allocation4], 1 }

</bundles_post_ra>
